<compile_context>
chip_gen: v6e
topology: v6e:2x2x1
jax: 0.10.0
libtpu: 0.0.40
codegen_flags: <defaults>
</compile_context>

<pallas_src>
import jax
import jax.numpy as jnp
from jax import lax
from jax.experimental import pallas as pl
from jax.experimental.pallas import tpu as pltpu

HIDDEN = 128   # lane-aligned hidden size
VOCAB = 64
_EPS = 1e-8    # cosine-similarity clamping (matches reference semantics)


# ----------------------------------------------------------------------------
# Fused kernel: CLS projection (MXU) + cosine similarities, one batch element
# per grid step.
# ----------------------------------------------------------------------------
def _rerank_kernel(cand_ref, ans_ref, pass_ref, w_ref, out_ref):
    """Block shapes:
      cand_ref: (1, C, H)  bf16   CLS rows of the C candidates
      ans_ref : (1, 1, H)  bf16   CLS row of the answer
      pass_ref: (1, 1, H)  bf16   CLS row of the passage
      w_ref   : (H, H)     bf16   encoder projection (resident across grid)
      out_ref : (1, 1, OUT) f32   lane-dense slab: [0:C]=can_scores, [C]=gold
    """
    eps_sq = jnp.float32(_EPS) ** 2  # clamp squared norms == max(norm, eps)

    w = w_ref[...]                   # (H, H)
    cand = cand_ref[0]               # (C, H)
    ans = ans_ref[0]                 # (1, H)
    pas = pass_ref[0]                # (1, H)

    # ---- encoder projection (MXU, bf16 in / f32 accumulate), stays in VMEM.
    cand_p = jnp.dot(cand, w, preferred_element_type=jnp.float32)   # (C, H)
    ans_p = jnp.dot(ans, w, preferred_element_type=jnp.float32)     # (1, H)
    pas_p = jnp.dot(pas, w, preferred_element_type=jnp.float32)     # (1, H)

    # ---- inverse norms via rsqrt (EUP) of clamped squared norms (f32).
    pas_inv = lax.rsqrt(
        jnp.maximum(jnp.sum(pas_p * pas_p, axis=-1, keepdims=True), eps_sq))  # (1,1)
    ans_inv = lax.rsqrt(
        jnp.maximum(jnp.sum(ans_p * ans_p, axis=-1, keepdims=True), eps_sq))  # (1,1)

    # gold = cos(passage, answer)
    gold = jnp.sum(pas_p * ans_p, axis=-1, keepdims=True) * pas_inv * ans_inv  # (1,1)

    # Candidate dot products / squared norms as lane-dense (1, C) rows via
    # MXU "A @ B^T" (contract the H axis of both operands), full f32 precision.
    dn_t = (((1,), (1,)), ((), ()))
    can_dot = lax.dot_general(pas_p, cand_p, dn_t,
                              precision=lax.Precision.HIGHEST,
                              preferred_element_type=jnp.float32)       # (1, C)
    ones_row = jnp.ones((1, cand_p.shape[1]), jnp.float32)
    can_sq = lax.dot_general(ones_row, cand_p * cand_p, dn_t,
                             precision=lax.Precision.HIGHEST,
                             preferred_element_type=jnp.float32)        # (1, C)
    can_inv = lax.rsqrt(jnp.maximum(can_sq, eps_sq))

    can_scores = can_dot * can_inv * pas_inv                            # (1, C)

    # ---- lane-dense output slab: [0:C]=can_scores, [C]=gold, rest zero.
    n_cand = can_scores.shape[1]
    out_ref[...] = jnp.zeros_like(out_ref)
    out_ref[0, :, 0:n_cand] = can_scores
    out_ref[0, :, n_cand:n_cand + 1] = gold


def fused_rerank_pallas(cand_cls, ans_cls, pass_cls, proj_w):
    """cand_cls (B,C,H) bf16, ans_cls/pass_cls (B,1,H) bf16, proj_w (H,H) bf16
    -> (B, 1, OUT) f32 score slab."""
    B, C, H = cand_cls.shape
    assert H % 128 == 0, "hidden size must be lane-aligned"
    assert proj_w.shape == (H, H)
    out_lanes = ((C + 1 + 127) // 128) * 128   # lane-dense output width

    return pl.pallas_call(
        _rerank_kernel,
        out_shape=jax.ShapeDtypeStruct((B, 1, out_lanes), jnp.float32),
        grid=(B,),
        in_specs=[
            pl.BlockSpec((1, C, H), lambda b: (b, 0, 0)),
            pl.BlockSpec((1, 1, H), lambda b: (b, 0, 0)),
            pl.BlockSpec((1, 1, H), lambda b: (b, 0, 0)),
            pl.BlockSpec((H, H), lambda b: (0, 0)),        # weight stays resident
        ],
        out_specs=pl.BlockSpec((1, 1, out_lanes), lambda b: (b, 0, 0)),
        compiler_params=pltpu.CompilerParams(
            dimension_semantics=("parallel",),             # v7x: use both TCs
            vmem_limit_bytes=32 * 1024 * 1024,             # safe on v5e/v6e/v7x
        ),
    )(cand_cls, ans_cls, pass_cls, proj_w)


# ----------------------------------------------------------------------------
# Synthetic "encoder" front-end: only the CLS (token 0) row is ever needed by
# the score path, so only that row is embedded (gather kept in plain XLA).
# ----------------------------------------------------------------------------
def _cls_rows(ids, mask, embed_table):
    tok0 = ids[..., 0]
    m0 = mask[..., 0].astype(embed_table.dtype)
    return embed_table[tok0] * m0[..., None]


# ----------------------------------------------------------------------------
# Reranker.forward equivalent
# ----------------------------------------------------------------------------
def reranker_forward(candidates, answers, passages, embed_table, proj_w):
    cand_ids, cand_mask = candidates
    bsz, n_cand, _ = cand_ids.shape

    cand_cls = _cls_rows(cand_ids, cand_mask, embed_table)                    # (B, C, H)
    ans_cls = _cls_rows(answers[0].reshape(bsz, -1),
                        answers[1].reshape(bsz, -1), embed_table)[:, None, :]  # (B, 1, H)
    pass_cls = _cls_rows(passages[0].reshape(bsz, -1),
                         passages[1].reshape(bsz, -1), embed_table)[:, None, :]  # (B, 1, H)

    out = fused_rerank_pallas(cand_cls.astype(jnp.bfloat16),
                              ans_cls.astype(jnp.bfloat16),
                              pass_cls.astype(jnp.bfloat16),
                              proj_w.astype(jnp.bfloat16))                    # (B, 1, OUT)

    can_scores = out[:, 0, :n_cand]     # (B, C)
    gold_scores = out[:, 0, n_cand]     # (B,)
    return can_scores, gold_scores


# ----------------------------------------------------------------------------
# Pure-JAX reference for correctness (same synthetic encoder, same bf16 MXU
# projection, f32 cosine math).
# ----------------------------------------------------------------------------
def _ref_cos(a, b, eps=_EPS):
    inv_a = lax.rsqrt(jnp.maximum(jnp.sum(a * a, axis=-1), eps * eps))
    inv_b = lax.rsqrt(jnp.maximum(jnp.sum(b * b, axis=-1), eps * eps))
    return jnp.sum(a * b, axis=-1) * inv_a * inv_b


if __name__ == "__main__":
    key = jax.random.PRNGKey(0)
    k_emb, k_w, k_c, k_a, k_p = jax.random.split(key, 5)

    B, C, S = 2, 4, 8  # batch, n_candidates, seq_len

    embed_table = jax.random.normal(k_emb, (VOCAB, HIDDEN), jnp.float32) * 0.1
    proj_w = jax.random.normal(k_w, (HIDDEN, HIDDEN), jnp.float32) * 0.05

    cand_ids = jax.random.randint(k_c, (B, C, S), 0, VOCAB, jnp.int32)
    cand_mask = jnp.ones((B, C, S), jnp.int32)
    ans_ids = jax.random.randint(k_a, (B, S), 0, VOCAB, jnp.int32)
    ans_mask = jnp.ones((B, S), jnp.int32)
    pass_ids = jax.random.randint(k_p, (B, S), 0, VOCAB, jnp.int32)
    pass_mask = jnp.ones((B, S), jnp.int32)

    can_scores, gold_scores = reranker_forward(
        (cand_ids, cand_mask), (ans_ids, ans_mask), (pass_ids, pass_mask),
        embed_table, proj_w)
    jax.block_until_ready((can_scores, gold_scores))

    # Reference path (plain JAX, same bf16-in / f32-acc projection).
    w_bf16 = proj_w.astype(jnp.bfloat16)

    def ref_project_cls(ids, mask):
        h0 = _cls_rows(ids, mask, embed_table)
        return jnp.dot(h0.astype(jnp.bfloat16), w_bf16,
                       preferred_element_type=jnp.float32)

    ce = ref_project_cls(cand_ids, cand_mask)            # (B, C, H)
    ae = ref_project_cls(ans_ids, ans_mask)              # (B, H)
    pe = ref_project_cls(pass_ids, pass_mask)            # (B, H)
    gold_ref = _ref_cos(pe, ae)
    can_ref = _ref_cos(jnp.broadcast_to(pe[:, None, :], ce.shape), ce)

    assert can_scores.shape == (B, C) and gold_scores.shape == (B,)
    assert jnp.allclose(can_scores, can_ref, atol=1e-4)
    assert jnp.allclose(gold_scores, gold_ref, atol=1e-4)
    print("KERNEL_OK")
</pallas_src>

<mosaic_0001>
module attributes {stable_mosaic.version = 11 : i64} {
  func.func @_rerank_kernel(%arg0: i32, %arg1: memref<1x4x128xbf16, #tpu.memory_space<vmem>>, %arg2: memref<1x1x128xbf16, #tpu.memory_space<vmem>>, %arg3: memref<1x1x128xbf16, #tpu.memory_space<vmem>>, %arg4: memref<128x128xbf16, #tpu.memory_space<vmem>>, %arg5: memref<1x1x128xf32, #tpu.memory_space<vmem>>) attributes {dimension_semantics = [#tpu.dimension_semantics<parallel>], iteration_bounds = array<i64: 2>, scalar_prefetch = 0 : i64, scratch_operands = 0 : i64, tpu.core_type = #tpu.core_type<tc>, window_params = [{transform_indices = @transform_0, window_bounds = array<i64: 1, 4, 128>}, {transform_indices = @transform_1, window_bounds = array<i64: 1, 1, 128>}, {transform_indices = @transform_2, window_bounds = array<i64: 1, 1, 128>}, {pipeline_mode = #tpu.pipeline_mode<synchronous>, transform_indices = @transform_3, window_bounds = array<i64: 128, 128>}, {transform_indices = @transform_4, window_bounds = array<i64: 1, 1, 128>}]} {
    %cst = arith.constant 9.99999993E-9 : f32
    %0 = arith.mulf %cst, %cst : f32
    %c0 = arith.constant 0 : index
    %c0_0 = arith.constant 0 : index
    %1 = vector.load %arg4[%c0, %c0_0] : memref<128x128xbf16, #tpu.memory_space<vmem>>, vector<128x128xbf16>
    %c0_1 = arith.constant 0 : index
    %c0_2 = arith.constant 0 : index
    %c0_3 = arith.constant 0 : index
    %2 = vector.load %arg1[%c0_1, %c0_2, %c0_3] : memref<1x4x128xbf16, #tpu.memory_space<vmem>>, vector<1x4x128xbf16>
    %3 = vector.shape_cast %2 : vector<1x4x128xbf16> to vector<4x128xbf16>
    %c0_4 = arith.constant 0 : index
    %c0_5 = arith.constant 0 : index
    %c0_6 = arith.constant 0 : index
    %4 = vector.load %arg2[%c0_4, %c0_5, %c0_6] : memref<1x1x128xbf16, #tpu.memory_space<vmem>>, vector<1x1x128xbf16>
    %5 = vector.shape_cast %4 : vector<1x1x128xbf16> to vector<1x128xbf16>
    %c0_7 = arith.constant 0 : index
    %c0_8 = arith.constant 0 : index
    %c0_9 = arith.constant 0 : index
    %6 = vector.load %arg3[%c0_7, %c0_8, %c0_9] : memref<1x1x128xbf16, #tpu.memory_space<vmem>>, vector<1x1x128xbf16>
    %7 = vector.shape_cast %6 : vector<1x1x128xbf16> to vector<1x128xbf16>
    %cst_10 = arith.constant dense<0.000000e+00> : vector<4x128xf32>
    %8 = tpu.matmul %3, %1, %cst_10 {dimension_numbers = #tpu.dot_dimension_numbers<[1], [0], [0], [1], [0, 0, 1, 1], [], []>} : vector<4x128xbf16>, vector<128x128xbf16>, vector<4x128xf32> -> vector<4x128xf32>
    %cst_11 = arith.constant dense<0.000000e+00> : vector<1x128xf32>
    %9 = tpu.matmul %5, %1, %cst_11 {dimension_numbers = #tpu.dot_dimension_numbers<[1], [0], [0], [1], [0, 0, 1, 1], [], []>} : vector<1x128xbf16>, vector<128x128xbf16>, vector<1x128xf32> -> vector<1x128xf32>
    %cst_12 = arith.constant dense<0.000000e+00> : vector<1x128xf32>
    %10 = tpu.matmul %7, %1, %cst_12 {dimension_numbers = #tpu.dot_dimension_numbers<[1], [0], [0], [1], [0, 0, 1, 1], [], []>} : vector<1x128xbf16>, vector<128x128xbf16>, vector<1x128xf32> -> vector<1x128xf32>
    %11 = arith.mulf %10, %10 : vector<1x128xf32>
    %cst_13 = arith.constant dense<0.000000e+00> : vector<1xf32>
    %12 = vector.multi_reduction <add>, %11, %cst_13 [1] : vector<1x128xf32> to vector<1xf32>
    %13 = vector.shape_cast %12 : vector<1xf32> to vector<1x1xf32>
    %14 = vector.broadcast %0 : f32 to vector<1x1xf32>
    %15 = arith.maximumf %13, %14 : vector<1x1xf32>
    %16 = math.rsqrt %15 : vector<1x1xf32>
    %17 = arith.mulf %9, %9 : vector<1x128xf32>
    %cst_14 = arith.constant dense<0.000000e+00> : vector<1xf32>
    %18 = vector.multi_reduction <add>, %17, %cst_14 [1] : vector<1x128xf32> to vector<1xf32>
    %19 = vector.shape_cast %18 : vector<1xf32> to vector<1x1xf32>
    %20 = vector.broadcast %0 : f32 to vector<1x1xf32>
    %21 = arith.maximumf %19, %20 : vector<1x1xf32>
    %22 = math.rsqrt %21 : vector<1x1xf32>
    %23 = arith.mulf %10, %9 : vector<1x128xf32>
    %cst_15 = arith.constant dense<0.000000e+00> : vector<1xf32>
    %24 = vector.multi_reduction <add>, %23, %cst_15 [1] : vector<1x128xf32> to vector<1xf32>
    %25 = vector.shape_cast %24 : vector<1xf32> to vector<1x1xf32>
    %26 = arith.mulf %25, %16 : vector<1x1xf32>
    %27 = arith.mulf %26, %22 : vector<1x1xf32>
    %cst_16 = arith.constant dense<0.000000e+00> : vector<1x4xf32>
    %28 = tpu.matmul %10, %8, %cst_16 {dimension_numbers = #tpu.dot_dimension_numbers<[1], [1], [0], [0], [0, 0, 1, 0], [], []>, precision = #tpu.contract_precision<fp32>} : vector<1x128xf32>, vector<4x128xf32>, vector<1x4xf32> -> vector<1x4xf32>
    %cst_17 = arith.constant 1.000000e+00 : f32
    %29 = vector.broadcast %cst_17 : f32 to vector<1x128xf32>
    %30 = arith.mulf %8, %8 : vector<4x128xf32>
    %cst_18 = arith.constant dense<0.000000e+00> : vector<1x4xf32>
    %31 = tpu.matmul %29, %30, %cst_18 {dimension_numbers = #tpu.dot_dimension_numbers<[1], [1], [0], [0], [0, 0, 1, 0], [], []>, precision = #tpu.contract_precision<fp32>} : vector<1x128xf32>, vector<4x128xf32>, vector<1x4xf32> -> vector<1x4xf32>
    %32 = vector.broadcast %0 : f32 to vector<1x4xf32>
    %33 = arith.maximumf %31, %32 : vector<1x4xf32>
    %34 = math.rsqrt %33 : vector<1x4xf32>
    %35 = arith.mulf %28, %34 : vector<1x4xf32>
    %36 = vector.broadcast %16 : vector<1x1xf32> to vector<1x4xf32>
    %37 = arith.mulf %35, %36 : vector<1x4xf32>
    %cst_19 = arith.constant 0.000000e+00 : f32
    %38 = vector.broadcast %cst_19 : f32 to vector<1x1x128xf32>
    %c0_20 = arith.constant 0 : index
    %c0_21 = arith.constant 0 : index
    %c0_22 = arith.constant 0 : index
    %39 = vector.load %arg5[%c0_20, %c0_21, %c0_22] : memref<1x1x128xf32, #tpu.memory_space<vmem>>, vector<1x1x128xf32>
    tpu.vector_store %arg5[%c0_20, %c0_21, %c0_22], %38 {strides = array<i32>} : memref<1x1x128xf32, #tpu.memory_space<vmem>>, vector<1x1x128xf32>,
    %c0_23 = arith.constant 0 : index
    %c0_24 = arith.constant 0 : index
    %c0_25 = arith.constant 0 : index
    %40 = vector.load %arg5[%c0_23, %c0_24, %c0_25] : memref<1x1x128xf32, #tpu.memory_space<vmem>>, vector<1x1x4xf32>
    %41 = vector.shape_cast %40 : vector<1x1x4xf32> to vector<1x4xf32>
    %42 = vector.shape_cast %37 : vector<1x4xf32> to vector<1x1x4xf32>
    tpu.vector_store %arg5[%c0_23, %c0_24, %c0_25], %42 {strides = array<i32>} : memref<1x1x128xf32, #tpu.memory_space<vmem>>, vector<1x1x4xf32>,
    %c0_26 = arith.constant 0 : index
    %c0_27 = arith.constant 0 : index
    %c4 = arith.constant 4 : index
    %43 = vector.load %arg5[%c0_26, %c0_27, %c4] : memref<1x1x128xf32, #tpu.memory_space<vmem>>, vector<1x1x1xf32>
    %44 = vector.shape_cast %43 : vector<1x1x1xf32> to vector<1x1xf32>
    %45 = vector.shape_cast %27 : vector<1x1xf32> to vector<1x1x1xf32>
    tpu.vector_store %arg5[%c0_26, %c0_27, %c4], %45 {strides = array<i32>} : memref<1x1x128xf32, #tpu.memory_space<vmem>>, vector<1x1x1xf32>,
    return
  }
  func.func @transform_0(%arg0: i32) -> (i32, i32, i32) {
    %c0_i32 = arith.constant 0 : i32
    %c0_i32_0 = arith.constant 0 : i32
    %c0_i32_1 = arith.constant 0 : i32
    return %arg0, %c0_i32, %c0_i32_0 : i32, i32, i32
  }
  func.func @transform_1(%arg0: i32) -> (i32, i32, i32) {
    %c0_i32 = arith.constant 0 : i32
    %c0_i32_0 = arith.constant 0 : i32
    %c0_i32_1 = arith.constant 0 : i32
    return %arg0, %c0_i32, %c0_i32_0 : i32, i32, i32
  }
  func.func @transform_2(%arg0: i32) -> (i32, i32, i32) {
    %c0_i32 = arith.constant 0 : i32
    %c0_i32_0 = arith.constant 0 : i32
    %c0_i32_1 = arith.constant 0 : i32
    return %arg0, %c0_i32, %c0_i32_0 : i32, i32, i32
  }
  func.func @transform_3(%arg0: i32) -> (i32, i32) {
    %c0_i32 = arith.constant 0 : i32
    %c0_i32_0 = arith.constant 0 : i32
    %c0_i32_1 = arith.constant 0 : i32
    return %c0_i32, %c0_i32_0 : i32, i32
  }
  func.func @transform_4(%arg0: i32) -> (i32, i32, i32) {
    %c0_i32 = arith.constant 0 : i32
    %c0_i32_0 = arith.constant 0 : i32
    %c0_i32_1 = arith.constant 0 : i32
    return %arg0, %c0_i32, %c0_i32_0 : i32, i32, i32
  }
}

</mosaic_0001>

<bundles_post_ra>
// kernel: tpu_custom_call.1
= control target key start
LH: loop header
LB: loop body
LE: loop exit
PB: predicated region body
PF: predicated region fallthrough
CT: control target
= control target key end

     0   :  { %9 = vsyncpa [#allocation3], 0  ;;  %s2019_s0 = inlined_call_operand.vmem [shape: bf16[2,4,128], index: 0, kind: input, shape index: {}]   ;;  %s2020_s1 = inlined_call_operand.vmem [shape: bf16[2,1,128], index: 1, kind: input, shape index: {}]   ;;  %s2021_s2 = inlined_call_operand.vmem [shape: bf16[2,1,128], index: 2, kind: input, shape index: {}]   ;;  %s2022_s3 = inlined_call_operand.hbm [shape: bf16[128,128], index: 3, kind: input, shape index: {}]   ;;  %s2023_s4 = inlined_call_operand.hbm [shape: f32[2,1,128], index: 4, kind: output, shape index: {}]  }
   0x1   :  { %10 = vsyncpa [#allocation4], 0 }
   0x2   :  { %12 = vsyncpa [#allocation4 + $0x1], 0  ;;  %s1811_s15 = smov 0   ;;  %s1813_s16 = smov 0  }
   0x3   :  { %s1815_s17 = smov 0   ;;  %s1817_s18 = smov 0  }
   0x4 LB: > { %s1832_s19 = sadd.s32 4294967295, %s1777_s18   ;;  %s1429_s20 = sadd.s32 4294967294, %s1777_s18   ;;  %s1777_s18 = sphi %s1817_s18, %s2031_s18   ;;  %s1773_s17 = sphi %s1815_s17, %s2030_s17   ;;  %s1769_s16 = sphi %s1813_s16, %s2029_s16   ;;  %s1765_s15 = sphi %s1811_s15, %s2028_s15  }
   0x5   : > { %s1836_s21 = sadd.s32 1, %s1777_s18   ;;  %s124_s22 = sadd.s32 1, %s1773_s17 }
   0x6   : > { %s121_s23 = ssub.s32 %s1777_s18, %s1836_s21  ;;  %p134_p0 = scmp.ne.s32.totalorder %s1773_s17, %s1769_s16 }
   0x7   : > { %p122_p1 = scmp.eq.s32.totalorder %s121_s23, 0  ;;  %p135_p2 = scmp.eq.s32.totalorder %s1832_s19, 1 }
   0x8   : > { %p140_p3 = scmp.ne.s32.totalorder %s1769_s16, %s1765_s15  ;;  %p141_p4 = scmp.eq.s32.totalorder %s1429_s20, 1 }
   0x9   : > { %s1847_s24 = scalar_select %p122_p1, %s1773_s17, %s124_s22  }
   0xa   : > { %p1849_p5 = por %p135_p2, %p134_p0  ;;  %p1853_p6 = por %p141_p4, %p140_p3 }
   0xb   : > { %p1430_p7 = scmp.ge.s32.totalorder %s1777_s18, 1  ;;  %p148_p8 = scmp.lt.s32.totalorder %s1777_s18, 3 }
   0xc   : > { %s2025_s26 = scalar_select %p1853_p6, 1, 0 }
   0xd   : > { %p1632_p9 = scmp.eq.s32.totalorder %s1832_s19, 0  ;;  %p1860_p10 = pnand %p1430_p7, %p148_p8 }
   0xe   : > { %s1779_s28 = smov [#allocation2]  }
   0xf   : > { %s160_s29 = sshll.u32 %s1779_s28, 4  ;;  %p1624_p11 = pneg %p1860_p10  ;;  %s161_s29 = int_to_ptr.vmem [resolvable:$true] %s160_s29 }
  0x10   : > { %s1698_s30 = scalar_lea.vmem %s161_s29, 1024  ;;  %p1706_p3 = scmp.lt.s32.totalorder %s161_s29, %s161_s29 }
  0x11   : > { %p1625_p12 = pnand %p1632_p9, %p1624_p11  ;;  %p1699_p0 = scmp.ne.s32.totalorder %s161_s29, %s1698_s30 }
  0x12   : > { %p1707_p4 = scmp.lt.s32.totalorder %s1698_s30, %s1698_s30 }
  0x13   : > { %p1689_p13 = pneg %p1625_p12 }
  0x14   : > { %p1708_p6 = por %p1707_p4, %p1706_p3 }
  0x15   : > { %p1701_p1 = pnand %p1699_p0, %p1689_p13 }
  0x17   : > { %p1702_p2 = pneg %p1701_p1 }
  0x19   : > { %p1709_p7 = pnand %p1708_p6, %p1702_p2 }
  0x1b   : > { %1712 = shalt.err (!%p1709_p7)
}
  0x1c   : > { %s1780_s5 = smov 64   ;;  %s1781_s6 = smov 4  }
  0x1d   : > { %1627 = dma.hbm_to_vmem [thread:$0]  (!%p1625_p12), %s2022_s3, 1024, %s161_s29, [#allocation3], %s1780_s5, %s1780_s5, %s1781_s6  }
  0x1e   : > { %195 = sbr.rel (%p1860_p10) target bundleno = 570 (0x23a), region = 36 }
  0x23   : > { %1756 = dma.done.wait (%p1632_p9), [#allocation3], 1024  }
  0x24   : > { %1758 = vsyncadd (%p1632_p9), [#allocation3], 4294966272  ;;  %v1782_v0 = vmov 0.0   ;;  %vm1783_vm0 = vmmov 0   ;;  %v1673_v1 = vld [vmem:[#allocation2 + $0x38] sm:$0xff]   ;;  %v1674_v2 = vld [vmem:[#allocation2 + $0x30] sm:$0xff]  }
  0x25   : > { %1498 = vmatprep.subr.bf16.mxu0 %v1782_v0  ;;  %1514 = vmatprep.mubr.msk.bf16.mxu0 %vm1783_vm0, %v1782_v0  ;;  %v1675_v3 = vld [vmem:[#allocation2 + $0x28] sm:$0xff]   ;;  %v1676_v4 = vld [vmem:[#allocation2 + $0x20] sm:$0xff]   ;;  %v1677_v5 = vld [vmem:[#allocation2 + $0x18] sm:$0xff]   ;;  %p225_p6 = scmp.lt.s32.totalorder %s1832_s19, 1  ;;  %v1784_v25 = vmov 1.0   ;;  %vm424_vm1 = vcmask 1040384  }
  0x26   : > { %1518 = vmatprep.subr.bf16.mxu1 %v1782_v0  ;;  %1534 = vmatprep.mubr.msk.bf16.mxu1 %vm1783_vm0, %v1782_v0  ;;  %v1678_v6 = vld [vmem:[#allocation2 + $0x10] sm:$0xff]   ;;  %v1679_v7 = vld [vmem:[#allocation2 + $0x8] sm:$0xff]   ;;  %v1680_v8 = vld [vmem:[#allocation2] sm:$0xff]   ;;  %s223_s29 = sand.u32 1, %s1769_s16   ;;  %s1444_s5 = sshll.u32 %s1832_s19, 4  ;;  %vm1327_vm2 = vcmask 24576  }
  0x27   : > { %1499 = vmatpush3.bf16.msra.mxu0 %v1673_v1  ;;  %1519 = vmatpush3.bf16.msra.mxu1 %v1673_v1  ;;  %s1895_s9 = scalar_select %p225_p6, %s1832_s19, 1  ;;  %vm1329_vm3 = vcmask 32800  }
  0x28   : > { %1500 = vmatprep.subr.bf16.mxu0 %v1782_v0  ;;  %1520 = vmatprep.subr.bf16.mxu1 %v1782_v0  ;;  %s1971_s30 = scalar_lea.vmem [#allocation5], %s223_s29  ;;  %s1785_s19 = smov [#allocation5]  }
  0x29   : > { %s1435_s10 = sshll.u32 %s1895_s9, 1  ;;  %s231_s22 = scalar_lea.vmem %s2020_s1, %s1895_s9  ;;  %1326 = vst [vmem:[%s1971_s30] sm:$0x1] %v1782_v0 }
  0x2a   : > { %s228_s13 = scalar_lea.vmem %s2019_s0, %s1435_s10  ;;  %v253_v10 = vld [vmem:[%s231_s22] sm:$0x1]  ;;  %s234_s28 = scalar_lea.vmem %s2021_s2, %s1895_s9 }
  0x2b   : > { %1501 = vmatpush3.bf16.msra.mxu0 %v1674_v2  ;;  %1521 = vmatpush3.bf16.msra.mxu1 %v1674_v2  ;;  %v252_v9 = vld [vmem:[%s228_s13] sm:$0x3]  ;;  %s1344_s6 = sshll.u32 %s1971_s30, 4  ;;  %s1980_s9 = scalar_lea.hbm %s2023_s4, %s1444_s5  ;;  %s1345_s6 = int_to_ptr.vmem [resolvable:$true] %s1344_s6 }
  0x2c   : > { %1502 = vmatprep.subr.bf16.mxu0 %v1782_v0  ;;  %1522 = vmatprep.subr.bf16.mxu1 %v1782_v0  ;;  %v254_v11 = vld [vmem:[%s234_s28] sm:$0x1]  ;;  %s1332_s10 = scalar_lea.sflag [#allocation4], %s223_s29  ;;  %s1713_s11 = scalar_lea.vmem %s1345_s6, 16 }
  0x2d   : > { %p1714_p8 = scmp.ne.s32.totalorder %s1345_s6, %s1713_s11  ;;  %s1717_s12 = sshll.u32 %s1785_s19, 4  ;;  %s1718_s12 = int_to_ptr.vmem [resolvable:$false] %s1717_s12 }
  0x2e   : > { %s1719_s13 = scalar_lea.vmem %s1718_s12, 32  ;;  %p1720_p11 = scmp.lt.s32.totalorder %s1345_s6, %s1718_s12 }
  0x2f   : > { %1503 = vmatpush3.bf16.msra.mxu0 %v1675_v3  ;;  %1523 = vmatpush3.bf16.msra.mxu1 %v1675_v3  ;;  %p1715_p9 = pnand %p1714_p8, %p1849_p5  ;;  %p1721_p12 = scmp.lt.s32.totalorder %s1719_s13, %s1713_s11 }
  0x30   : > { %1504 = vmatprep.subr.bf16.mxu0 %v1782_v0  ;;  %1524 = vmatprep.subr.bf16.mxu1 %v1782_v0 }
  0x31   : > { %p1716_p10 = pneg %p1715_p9  ;;  %p1722_p13 = por %p1721_p12, %p1720_p11 }
  0x33   : > { %1505 = vmatpush3.bf16.msra.mxu0 %v1676_v4  ;;  %1525 = vmatpush3.bf16.msra.mxu1 %v1676_v4  ;;  %p1723_p0 = pnand %p1722_p13, %p1716_p10 }
  0x34   : > { %1506 = vmatprep.subr.bf16.mxu0 %v1782_v0  ;;  %1526 = vmatprep.subr.bf16.mxu1 %v1782_v0 }
  0x37   : > { %1507 = vmatpush3.bf16.msra.mxu0 %v1677_v5  ;;  %1527 = vmatpush3.bf16.msra.mxu1 %v1677_v5 }
  0x38   : > { %1508 = vmatprep.subr.bf16.mxu0 %v1782_v0  ;;  %1528 = vmatprep.subr.bf16.mxu1 %v1782_v0 }
  0x3b   : > { %1509 = vmatpush3.bf16.msra.mxu0 %v1678_v6  ;;  %1529 = vmatpush3.bf16.msra.mxu1 %v1678_v6 }
  0x3c   : > { %1510 = vmatprep.subr.bf16.mxu0 %v1782_v0  ;;  %1530 = vmatprep.subr.bf16.mxu1 %v1782_v0 }
  0x3f   : > { %1511 = vmatpush3.bf16.msra.mxu0 %v1679_v7  ;;  %1531 = vmatpush3.bf16.msra.mxu1 %v1679_v7 }
  0x40   : > { %1512 = vmatprep.subr.bf16.mxu0 %v1782_v0  ;;  %1532 = vmatprep.subr.bf16.mxu1 %v1782_v0 }
  0x43   : > { %1513 = vmatpush3.bf16.msra.mxu0 %v1680_v8  ;;  %1533 = vmatpush3.bf16.msra.mxu1 %v1680_v8 }
  0x44   : > { %1538 = vmatprep.subr.bf16.mxu0 %v1782_v0  ;;  %1558 = vmatprep.subr.mxu1 %v1782_v0 }
  0x46   : > { %1515 = vmatmul.mubr.bf16.vlgmr.msra.gmra.mxu0 %v252_v9  ;;  %1535 = vmatmul.mubr.bf16.vlgmr.msra.gmra.mxu1 %v253_v10 }
  0x47   : > { %1539 = vmatpush3.bf16.msra.mxu0 %v1673_v1  ;;  %1554 = vmatprep.mubr.msk.bf16.mxu0 %vm1783_vm0, %v1782_v0 }
  0x48   : > { %1540 = vmatprep.subr.bf16.mxu0 %v1782_v0  ;;  %1560 = vmatprep.mubr.msk.f32.mxu1 %vm1783_vm0, %v1782_v0 }
  0x4b   : > { %1541 = vmatpush3.bf16.msra.mxu0 %v1674_v2 }
  0x4c   : > { %1542 = vmatprep.subr.bf16.mxu0 %v1782_v0 }
  0x4f   : > { %1543 = vmatpush3.bf16.msra.mxu0 %v1675_v3 }
  0x50   : > { %1544 = vmatprep.subr.bf16.mxu0 %v1782_v0 }
  0x53   : > { %1545 = vmatpush3.bf16.msra.mxu0 %v1676_v4 }
  0x54   : > { %1546 = vmatprep.subr.bf16.mxu0 %v1782_v0 }
  0x57   : > { %1547 = vmatpush3.bf16.msra.mxu0 %v1677_v5 }
  0x58   : > { %1548 = vmatprep.subr.bf16.mxu0 %v1782_v0 }
  0x5b   : > { %1549 = vmatpush3.bf16.msra.mxu0 %v1678_v6 }
  0x5c   : > { %1550 = vmatprep.subr.bf16.mxu0 %v1782_v0 }
  0x5f   : > { %1551 = vmatpush3.bf16.msra.mxu0 %v1679_v7 }
  0x60   : > { %1552 = vmatprep.subr.bf16.mxu0 %v1782_v0 }
  0x63   : > { %1553 = vmatpush3.bf16.msra.mxu0 %v1680_v8 }
  0x64   : > { %1598 = vmatprep.subr.mxu0 %v1782_v0 }
  0x66   : > { %1555 = vmatmul.mubr.bf16.vlgmr.msra.gmra.mxu0 %v254_v11 }
  0x67   : > { %1600 = vmatprep.mubr.msk.f32.mxu0 %vm1783_vm0, %v1782_v0 }
 0x106   : > { %v337_v12 = vpop.f32.mrf.mxu0  ;;  %v377_v13 = vpop.f32.mrf.mxu1 }
 0x107   : > { %v473_v14 = vand.u32 4294901760, %v337_v12  ;;  %v888_v15 = vmul.f32 %v337_v12, %v337_v12  ;;  %v430_v28 = vmul.f32 %v377_v13, %v377_v13 }
 0x108   : > { %v1516_v16 = vpop.f32.mrf.mxu0  ;;  %v1536_v17 = vpop.f32.mrf.mxu1 }
 0x109   : > { %v1929_v18 = vand.u32 4294901760, %v888_v15  ;;  %1559 = vmatpush3.xpose.msra.mxu1 %v473_v14  ;;  %v550_v26 = vsub.f32 %v337_v12, %v473_v14  ;;  %v431_v38 = vsel %vm424_vm1, %v430_v28, 0.0 }
 0x10a   : > { %v340_v19 = vpop.f32.mrf.mxu0  ;;  %1563 = vmatprep.subr.mxu1 %v1782_v0  ;;  %v380_v20 = vpop.f32.mrf.mxu1 }
 0x10b   : > { %v992_v21 = vsub.f32 %v888_v15, %v1929_v18  ;;  %v551_v32 = vand.u32 4294901760, %v550_v26 }
 0x10c   : > { %v1517_v22 = vpop.f32.mrf.mxu0  ;;  %v1537_v23 = vpop.f32.mrf.mxu1 }
 0x10d   : > { %1599 = vmatpush3.xpose.msra.mxu0 %v992_v21  ;;  %v993_v24 = vand.u32 4294901760, %v992_v21  ;;  %v552_v41 = vsub.f32 %v550_v26, %v551_v32 }
 0x10e   : > { %1608 = vmatprep.subr.mxu0 %v1782_v0 }
 0x10f   : > { %v553_v44 = vand.u32 4294901760, %v552_v41  ;;  %v994_v45 = vsub.f32 %v992_v21, %v993_v24 }
 0x110   : > { %1601 = vmatmul.mubr.f32.vlgmr.msra.gmra.mxu0 %v1782_v0 }
 0x111   : > { %1609 = vmatpush3.xpose.msra.mxu0 %v993_v24  ;;  %1610 = vmatprep.mubr.msk.f32.mxu0 %vm1783_vm0, %v1782_v0  ;;  %v995_v46 = vand.u32 4294901760, %v994_v45 }
 0x114   : > { %1611 = vmatmul.mubr.f32.vlgmr.msra.gmra.mxu0 %v1784_v25 }
 0x126   : > { %v417_v27 = vpop.f32.mrf.mxu0 }
 0x127   : > { %v508_v29 = vand.u32 4294901760, %v417_v27  ;;  %v436_v30 = vmul.f32 %v417_v27, %v377_v13  ;;  %v423_v31 = vmul.f32 %v417_v27, %v417_v27 }
 0x128   : > { %v1556_v33 = vpop.f32.mrf.mxu0 }
 0x129   : > { %v509_v34 = vsub.f32 %v417_v27, %v508_v29  ;;  %v437_v35 = vsel %vm424_vm1, %v436_v30, 0.0  ;;  %v425_v36 = vsel %vm424_vm1, %v423_v31, 0.0 }
 0x12a   : > { %438 = vadd.xlane.f32.xlu1 %v437_v35  ;;  %426 = vadd.xlane.f32.xlu0 %v425_v36  ;;  %v420_v37 = vpop.f32.mrf.mxu0 }
 0x12b   : > { %v510_v39 = vand.u32 4294901760, %v509_v34 }
 0x12c   : > { %v1557_v40 = vpop.f32.mrf.mxu0 }
 0x12d   : > { %v511_v42 = vsub.f32 %v509_v34, %v510_v39 }
 0x12e   : > { %432 = vadd.xlane.f32.xlu0 %v431_v38 }
 0x12f   : > { %v512_v43 = vand.u32 4294901760, %v511_v42 }
 0x131   : > { %1561 = vmatmul.mubr.f32.vlgmr.msra.gmra.mxu1 %v512_v43 }
 0x132   : > { %1564 = vmatpush3.xpose.msra.mxu1 %v553_v44  ;;  %1565 = vmatprep.mubr.msk.f32.mxu1 %vm1783_vm0, %v1782_v0 }
 0x133   : > { %1568 = vmatprep.subr.mxu1 %v1782_v0 }
 0x135   : > { %1566 = vmatmul.mubr.f32.vlgmr.msra.gmra.mxu1 %v508_v29 }
 0x136   : > { %1569 = vmatpush3.xpose.msra.mxu1 %v550_v26  ;;  %1570 = vmatprep.mubr.msk.f32.mxu1 %vm1783_vm0, %v1782_v0 }
 0x137   : > { %1573 = vmatprep.subr.mxu1 %v1782_v0 }
 0x139   : > { %1571 = vmatmul.mubr.f32.vlgmr.msra.gmra.mxu1 %v509_v34 }
 0x13a   : > { %1574 = vmatpush3.xpose.msra.mxu1 %v473_v14  ;;  %1575 = vmatprep.mubr.msk.f32.mxu1 %vm1783_vm0, %v1782_v0 }
 0x13b   : > { %1578 = vmatprep.subr.mxu1 %v1782_v0 }
 0x13d   : > { %1576 = vmatmul.mubr.f32.vlgmr.msra.gmra.mxu1 %v510_v39 }
 0x13e   : > { %1579 = vmatpush3.xpose.msra.mxu1 %v551_v32  ;;  %1580 = vmatprep.mubr.msk.f32.mxu1 %vm1783_vm0, %v1782_v0 }
 0x13f   : > { %1583 = vmatprep.subr.mxu1 %v1782_v0 }
 0x141   : > { %1581 = vmatmul.mubr.f32.vlgmr.msra.gmra.mxu1 %v508_v29 }
 0x142   : > { %1584 = vmatpush3.xpose.msra.mxu1 %v473_v14  ;;  %1585 = vmatprep.mubr.msk.f32.mxu1 %vm1783_vm0, %v1782_v0 }
 0x143   : > { %1588 = vmatprep.subr.mxu1 %v1782_v0 }
 0x145   : > { %1586 = vmatmul.mubr.f32.vlgmr.msra.gmra.mxu1 %v508_v29 }
 0x146   : > { %1589 = vmatpush3.xpose.msra.mxu1 %v1929_v18  ;;  %1590 = vmatprep.mubr.msk.f32.mxu1 %vm1783_vm0, %v1782_v0 }
 0x147   : > { %1593 = vmatprep.subr.mxu1 %v1782_v0 }
 0x149   : > { %1591 = vmatmul.mubr.f32.vlgmr.msra.gmra.mxu1 %v1782_v0 }
 0x14a   : > { %1594 = vmatpush3.xpose.msra.mxu1 %v995_v46  ;;  %1595 = vmatprep.mubr.msk.f32.mxu1 %vm1783_vm0, %v1782_v0 }
 0x14b   : > { %1603 = vmatprep.subr.mxu1 %v1782_v0 }
 0x14d   : > { %1596 = vmatmul.mubr.f32.vlgmr.msra.gmra.mxu1 %v1784_v25 }
 0x14e   : > { %1604 = vmatpush3.xpose.msra.mxu1 %v1929_v18  ;;  %1605 = vmatprep.mubr.msk.f32.mxu1 %vm1783_vm0, %v1782_v0 }
 0x14f   : > { %1613 = vmatprep.subr.mxu1 %v1782_v0 }
 0x151   : > { %1606 = vmatmul.mubr.f32.vlgmr.msra.gmra.mxu1 %v1782_v0 }
 0x152   : > { %1614 = vmatpush3.xpose.msra.mxu1 %v1929_v18  ;;  %1615 = vmatprep.mubr.msk.f32.mxu1 %vm1783_vm0, %v1782_v0 }
 0x155   : > { %1616 = vmatmul.mubr.f32.vlgmr.msra.gmra.mxu1 %v1784_v25 }
 0x1b3   : > { %v427_v0 = vpop.xlane.xlu0 %426  ;;  %v439_v25 = vpop.xlane.xlu1 %438 }
 0x1b4   : > { %v428_v11 = vmax.f32 %v427_v0, 1e-16 }
 0x1b6   : > { %1681 = vrsqrt.f32 %v428_v11 }
 0x1b7   : > { %v433_v9 = vpop.xlane.xlu0 %432 }
 0x1b8   : > { %v434_v14 = vmax.f32 %v433_v9, 1e-16 }
 0x1c3   : > { %v1682_v21 = vpop.eup %1681 }
 0x1c4   : > { %v440_v27 = vmul.f32 %v1682_v21, %v439_v25 }
 0x1d0   : > { %v1103_v47 = vpop.f32.mrf.mxu0 }
 0x1d2   : > { %v1602_v48 = vpop.f32.mrf.mxu0 }
 0x1d4   : > { %v1247_v49 = vpop.f32.mrf.mxu0 }
 0x1d6   : > { %v1612_v50 = vpop.f32.mrf.mxu0 }
 0x1f1   : > { %v514_v51 = vpop.f32.mrf.mxu1 }
 0x1f3   : > { %v1562_v52 = vpop.f32.mrf.mxu1 }
 0x1f5   : > { %v590_v53 = vpop.f32.mrf.mxu1 }
 0x1f6   : > { %v591_v17 = vadd.f32 %v590_v53, %v514_v51 }
 0x1f7   : > { %v1567_v54 = vpop.f32.mrf.mxu1 }
 0x1f9   : > { %v664_v55 = vpop.f32.mrf.mxu1 }
 0x1fa   : > { %v665_v18 = vadd.f32 %v664_v55, %v591_v17 }
 0x1fb   : > { %v1572_v56 = vpop.f32.mrf.mxu1 }
 0x1fd   : > { %v738_v57 = vpop.f32.mrf.mxu1 }
 0x1fe   : > { %v739_v19 = vadd.f32 %v738_v57, %v665_v18 }
 0x1ff   : > { %v1577_v58 = vpop.f32.mrf.mxu1 }
 0x201   : > { %v812_v59 = vpop.f32.mrf.mxu1 }
 0x202   : > { %v813_v20 = vadd.f32 %v812_v59, %v739_v19 }
 0x203   : > { %v1582_v60 = vpop.f32.mrf.mxu1 }
 0x205   : > { %v884_v61 = vpop.f32.mrf.mxu1 }
 0x206   : > { %v885_v22 = vadd.f32 %v884_v61, %v813_v20 }
 0x207   : > { %v1587_v62 = vpop.f32.mrf.mxu1 }
 0x209   : > { %v956_v63 = vpop.f32.mrf.mxu1 }
 0x20b   : > { %v1592_v1 = vpop.f32.mrf.mxu1 }
 0x20d   : > { %v1031_v2 = vpop.f32.mrf.mxu1 }
 0x20e   : > { %v1032_v3 = vadd.f32 %v1031_v2, %v956_v63 }
 0x20f   : > { %v1597_v4 = vpop.f32.mrf.mxu1 }
 0x210   : > { %v1104_v5 = vadd.f32 %v1103_v47, %v1032_v3 }
 0x211   : > { %v1174_v6 = vpop.f32.mrf.mxu1 }
 0x212   : > { %v1175_v7 = vadd.f32 %v1174_v6, %v1104_v5 }
 0x213   : > { %v1607_v8 = vpop.f32.mrf.mxu1 }
 0x214   : > { %v1248_v10 = vadd.f32 %v1247_v49, %v1175_v7 }
 0x215   : > { %v1318_v12 = vpop.f32.mrf.mxu1 }
 0x216   : > { %v1319_v13 = vadd.f32 %v1318_v12, %v1248_v10 }
 0x217   : > { %v1617_v15 = vpop.f32.mrf.mxu1 }
 0x218   : > { %v1322_v16 = vmax.f32 %v1319_v13, 1e-16 }
 0x21a   : > { %1683 = vrsqrt.f32 %v1322_v16 }
 0x21b   : > { %1685 = vrsqrt.f32 %v434_v14 }
 0x227   : > { %v1684_v23 = vpop.eup %1683 }
 0x228   : > { %v1686_v24 = vpop.eup %1685  ;;  %v1324_v26 = vmul.f32 %v1684_v23, %v885_v22 }
 0x229   : > { %v441_v29 = vmul.f32 %v1686_v24, %v440_v27 }
 0x22a   : > { %v1325_v28 = vmul.f32 %v1682_v21, %v1324_v26 }
 0x22c   : > { %1328 = vst.msk [vmem:[%s1971_s30] sm:$0x1] %vm1327_vm2, %v1325_v28 }
 0x22d   : > { %1330 = vst.msk [vmem:[%s1971_s30] sm:$0x1] %vm1329_vm3, %v441_v29 }
 0x22e   : > { %1726 = shalt.err (!%p1723_p0)
}
 0x22f   : > { %s1727_s14 = scalar_lea.hbm %s1980_s9, 16  ;;  %s1731_s23 = scalar_lea.hbm %s2023_s4, 32 }
 0x230   : > { %p1728_p1 = scmp.ne.s32.totalorder %s1980_s9, %s1727_s14  ;;  %p1732_p4 = scmp.lt.s32.totalorder %s1980_s9, %s2023_s4 }
 0x231   : > { %p1733_p7 = scmp.lt.s32.totalorder %s1731_s23, %s1727_s14 }
 0x232   : > { %p1729_p2 = pnand %p1728_p1, %p1849_p5 }
 0x233   : > { %p1734_p6 = por %p1733_p7, %p1732_p4 }
 0x234   : > { %p1730_p3 = pneg %p1729_p2 }
 0x236   : > { %p1735_p8 = pnand %p1734_p6, %p1730_p3 }
 0x238   : > { %1738 = shalt.err (!%p1735_p8)
}
 0x239   : > { %1622 = dma.vmem_to_hbm [thread:$0]  (%p1849_p5), %s1345_s6, 16, %s1980_s9, %s1332_s10  }
 0x23a PF: > { %p1634_p9 = scmp.ge.s32.totalorder %s1777_s18, 2  ;;  %s1356_s29 = sand.u32 1, %s1765_s15  }
 0x23b   : > { %p2027_p10 = scmp.ne.s32.totalorder %s2025_s26, 0  ;;  %s1357_s30 = scalar_lea.sflag [#allocation4], %s1356_s29 }
 0x23d   : > { %p1629_p11 = pnand %p1634_p9, %p2027_p10 }
 0x23f   : > { %p1630_p12 = pneg %p1629_p11 }
 0x241   : > { %1760 = dma.done.wait (%p1630_p12), %s1357_s30, 16  }
 0x242   : > { %1762 = vsyncadd (%p1630_p12), %s1357_s30, 4294967280  ;;  %p15_p13 = scmp.ge.s32.totalorder %s1836_s21, 4   ;;  %s2028_s15 = smov %s1769_s16 }
 0x243   : > { %s2029_s16 = smov %s1773_s17  ;;  %s2030_s17 = smov %s1847_s24 }
 0x244   : > { %s2031_s18 = smov %s1836_s21  ;;  %17 = sbr.rel (!%p15_p13) target bundleno = 4 (0x4), region = 82 }
 0x249   :  { %1361 = vsyncpa [#allocation3], 1 }
 0x24a   :  { %1363 = vsyncpa [#allocation3 + $0x1], 1 }
 0x24b   :  { %1364 = vsyncpa [#allocation4], 1 }
 0x24c   :  { %1366 = vsyncpa [#allocation4 + $0x1], 1 }

</bundles_post_ra>
